<compile_context>
chip_gen: v7x
topology: tpu7x:2x2x1
jax: 0.10.0
libtpu: 0.0.40
codegen_flags: <defaults>
</compile_context>

<pallas_src>
import functools

import jax
import jax.numpy as jnp
from jax import lax
from jax.experimental import pallas as pl
from jax.experimental.pallas import tpu as pltpu


_TARGET_BLOCK_BYTES = 4 * 1024 * 1024    # ~4 MiB input block per grid step
_VMEM_WORK_BUDGET = 44 * 1024 * 1024     # 2x block + ~4 f32 temps must fit here
_VMEM_LIMIT_BYTES = 48 * 1024 * 1024     # <= v7x 64 MiB physical; fine on v5e/v6e


def _round_up(a, m):
    return ((a + m - 1) // m) * m


def _flat_vmem_need(tb, plane_in_bytes, plane_f32_bytes):
    # Flat path block is (tb, H*W): with tb < 8 the sublane dim pads to 8,
    # so account for that when estimating the VMEM working set.
    tb_pad = _round_up(max(tb, 1), 8)
    return 2 * tb_pad * plane_in_bytes + 4 * tb_pad * plane_f32_bytes + (2 << 20)


def _pick_tb(n, plane_in_bytes):
    """Planes per grid step for the flat path (multiple of 8, or n if n < 8)."""
    if n <= 8:
        return n
    tb = max(8, (_TARGET_BLOCK_BYTES // plane_in_bytes) // 8 * 8)
    tb = min(tb, _round_up(n, 8))
    # Keep at least two grid steps so both v7x TensorCores get work.
    tb = min(tb, _round_up(-(-n // 2), 8))
    tb = max(tb, 8)
    # Prefer a tb that divides n: removes ragged-tail masking from the body.
    if n % tb != 0:
        for cand in range(tb, 7, -8):
            if n % cand == 0 and 2 * cand >= tb:
                tb = cand
                break
    return tb


def _pick_tbp(n, plane_in_bytes, plane_f32_bytes):
    """Planes per grid step for the large-plane path."""
    per_plane = 2 * plane_in_bytes + 4 * plane_f32_bytes
    tbp = max(1, (_VMEM_WORK_BUDGET - (2 << 20)) // per_plane)
    tbp = min(tbp, n)
    if n > 1:
        tbp = min(tbp, -(-n // 2))           # >= 2 blocks for v7x megacore
    tbp = max(1, int(tbp))
    if n % tbp != 0:
        for cand in range(tbp, 0, -1):
            if n % cand == 0 and 2 * cand >= tbp:
                tbp = cand
                break
    return tbp


# --------------------------------------------------------------------------
# Kernels
# --------------------------------------------------------------------------

def _tv_flat_kernel(mh_ref, mw_ref, x_ref, o_ref, *, hw, w, n, tb, ragged):
    """Lane-dense path: `tb` flattened (H*W) planes per grid step."""
    x = x_ref[...].astype(jnp.float32)                       # (tb, hw)

    if ragged:
        # Last block reads past the real planes; tail rows are undefined, so
        # zero them with a select (NOT a multiply) before anything else.
        i = pl.program_id(0)
        row = lax.broadcasted_iota(jnp.int32, (tb, 1), 0)
        x = jnp.where(row < (n - i * tb), x, 0.0)

    # Neighbors in the flattened plane: +1 along W, +W along H.  With
    # jnp.roll semantics, rolling by (hw - k) brings x[j + k] to position j.
    # Rolls stay inside each row, so planes never mix.
    last = x.ndim - 1
    nxt_w = pltpu.roll(x, shift=hw - 1, axis=last)
    nxt_h = pltpu.roll(x, shift=hw - w, axis=last)

    dh = (nxt_h - x) * mh_ref[...]        # zero wrapped rows (precomputed mask)
    dw = (nxt_w - x) * mw_ref[...]        # zero wrapped cols

    h_sum = jnp.sum(dh * dh)
    w_sum = jnp.sum(dw * dw)
    lane = lax.broadcasted_iota(jnp.int32, (1, 1, 2), 2)
    o_ref[...] = jnp.where(lane == 0, h_sum, w_sum)


def _tv_plane_kernel(x_ref, o_ref, *, h, w, n, tbp, ragged):
    """Large-plane path: a few full (H, W) planes per grid step."""
    x = x_ref[...].astype(jnp.float32)                       # (tbp, H, W)

    if ragged:
        i = pl.program_id(0)
        pid = lax.broadcasted_iota(jnp.int32, (tbp, 1, 1), 0)
        x = jnp.where(pid < (n - i * tbp), x, 0.0)

    # Finite differences via XLU rolls + masks (no misaligned slice copies).
    nxt_h = pltpu.roll(x, shift=h - 1, axis=1)                # brings row r+1 to r
    nxt_w = pltpu.roll(x, shift=w - 1, axis=2)                # brings col c+1 to c

    row = lax.broadcasted_iota(jnp.int32, (1, h, 1), 1)
    col = lax.broadcasted_iota(jnp.int32, (1, 1, w), 2)
    dh = jnp.where(row < h - 1, nxt_h - x, 0.0)
    dw = jnp.where(col < w - 1, nxt_w - x, 0.0)

    h_sum = jnp.sum(dh * dh)
    w_sum = jnp.sum(dw * dw)
    lane = lax.broadcasted_iota(jnp.int32, (1, 1, 2), 2)
    o_ref[...] = jnp.where(lane == 0, h_sum, w_sum)


# --------------------------------------------------------------------------
# pallas_call wrappers
# --------------------------------------------------------------------------

def _tv_partials_flat(xf, H, W, tb):
    """xf: (N, H*W). Returns (num_blocks, 1, 2) partial sums [h_tv, w_tv]."""
    n, hw = xf.shape
    itemsize = xf.dtype.itemsize
    num_blocks = -(-n // tb)
    ragged = (n % tb) != 0

    idx = jnp.arange(hw, dtype=jnp.int32)
    mask_w = ((idx % W) < (W - 1)).astype(jnp.float32).reshape(1, hw)
    mask_h = (idx < (hw - W)).astype(jnp.float32).reshape(1, hw)

    kernel = functools.partial(_tv_flat_kernel, hw=hw, w=W, n=n, tb=tb,
                               ragged=ragged)
    cost = pl.CostEstimate(
        flops=10 * n * hw, transcendentals=0,
        bytes_accessed=n * hw * itemsize + 2 * hw * 4 + num_blocks * 8)

    return pl.pallas_call(
        kernel,
        out_shape=jax.ShapeDtypeStruct((num_blocks, 1, 2), jnp.float32),
        grid_spec=pltpu.PrefetchScalarGridSpec(
            num_scalar_prefetch=0,
            grid=(num_blocks,),
            in_specs=[
                pl.BlockSpec((1, hw), lambda i: (0, 0)),    # mask_h (resident)
                pl.BlockSpec((1, hw), lambda i: (0, 0)),    # mask_w (resident)
                pl.BlockSpec((tb, hw), lambda i: (i, 0)),   # image planes
            ],
            out_specs=pl.BlockSpec((1, 1, 2), lambda i: (i, 0, 0)),
        ),
        compiler_params=pltpu.CompilerParams(
            dimension_semantics=("parallel",),
            vmem_limit_bytes=_VMEM_LIMIT_BYTES,
        ),
        cost_estimate=cost,
    )(mask_h, mask_w, xf)


def _tv_partials_planes(xp, tbp):
    """xp: (N, H, W) with large planes. Returns (num_blocks, 1, 2) partials."""
    n, H, W = xp.shape
    itemsize = xp.dtype.itemsize
    num_blocks = -(-n // tbp)
    ragged = (n % tbp) != 0

    kernel = functools.partial(_tv_plane_kernel, h=H, w=W, n=n, tbp=tbp,
                               ragged=ragged)
    cost = pl.CostEstimate(
        flops=10 * n * H * W, transcendentals=0,
        bytes_accessed=n * H * W * itemsize + num_blocks * 8)

    return pl.pallas_call(
        kernel,
        out_shape=jax.ShapeDtypeStruct((num_blocks, 1, 2), jnp.float32),
        grid_spec=pltpu.PrefetchScalarGridSpec(
            num_scalar_prefetch=0,
            grid=(num_blocks,),
            in_specs=[pl.BlockSpec((tbp, H, W), lambda i: (i, 0, 0))],
            out_specs=pl.BlockSpec((1, 1, 2), lambda i: (i, 0, 0)),
        ),
        compiler_params=pltpu.CompilerParams(
            dimension_semantics=("parallel",),
            vmem_limit_bytes=_VMEM_LIMIT_BYTES,
        ),
        cost_estimate=cost,
    )(xp)


# --------------------------------------------------------------------------
# Public entry point (matches PyTorch L_TV.forward)
# --------------------------------------------------------------------------

def l_tv_loss(x, tv_weight=1.0):
    """Total-variation loss matching PyTorch L_TV.forward.

    Args:
      x: (B, C, H, W) image tensor (NCHW), f32 or bf16.
      tv_weight: TVLoss_weight from the module __init__.

    Returns:
      Scalar float32 loss.  Note: H == 1 or W == 1 divides by zero (NaN/Inf),
      matching the PyTorch module's behavior.
    """
    B, C, H, W = x.shape
    n = B * C
    hw = H * W
    count_h = (H - 1) * W
    count_w = H * (W - 1)
    itemsize = x.dtype.itemsize
    plane_in_bytes = hw * itemsize
    plane_f32_bytes = hw * 4

    tb = _pick_tb(n, plane_in_bytes)
    plane_need = 2 * plane_in_bytes + 4 * plane_f32_bytes + (2 << 20)

    if _flat_vmem_need(tb, plane_in_bytes, plane_f32_bytes) <= _VMEM_WORK_BUDGET:
        parts = _tv_partials_flat(x.reshape(n, hw), H, W, tb)
        h_tv = jnp.sum(parts[:, :, 0])
        w_tv = jnp.sum(parts[:, :, 1])
    elif plane_need <= _VMEM_WORK_BUDGET:
        tbp = _pick_tbp(n, plane_in_bytes, plane_f32_bytes)
        parts = _tv_partials_planes(x.reshape(n, H, W), tbp)
        h_tv = jnp.sum(parts[:, :, 0])
        w_tv = jnp.sum(parts[:, :, 1])
    else:
        # TODO(synk): row-tiled Pallas path with a 1-row halo for planes whose
        # working set exceeds the VMEM budget; plain-XLA fallback until then.
        xf = x.astype(jnp.float32)
        h_tv = jnp.sum((xf[:, :, 1:, :] - xf[:, :, :-1, :]) ** 2)
        w_tv = jnp.sum((xf[:, :, :, 1:] - xf[:, :, :, :-1]) ** 2)

    loss = tv_weight * 2.0 * (h_tv / count_h + w_tv / count_w) / B
    return loss.astype(jnp.float32)


def _l_tv_reference(x, tv_weight=1.0):
    """Pure-JAX reference for correctness checking."""
    B, C, H, W = x.shape
    count_h = (H - 1) * W
    count_w = H * (W - 1)
    xf = x.astype(jnp.float32)
    h_tv = jnp.sum((xf[:, :, 1:, :] - xf[:, :, :-1, :]) ** 2)
    w_tv = jnp.sum((xf[:, :, :, 1:] - xf[:, :, :, :-1]) ** 2)
    return tv_weight * 2.0 * (h_tv / count_h + w_tv / count_w) / B


if __name__ == "__main__":
    def _check(x, tv_weight, rtol, atol):
        loss = jax.block_until_ready(l_tv_loss(x, tv_weight=tv_weight))
        ref = jax.block_until_ready(_l_tv_reference(x, tv_weight=tv_weight))
        assert jnp.allclose(loss, ref, rtol=rtol, atol=atol), (loss, ref)

    key = jax.random.PRNGKey(0)
    k1, k2, k3, k4 = jax.random.split(key, 4)

    # 1) Small NCHW input: flat lane-dense path, single block, no ragged tail.
    _check(jax.random.uniform(k1, (2, 4, 16, 16), dtype=jnp.float32),
           tv_weight=1.0, rtol=1e-4, atol=1e-5)

    # 2) Larger planes, n < 8: flat path with tb == n.
    _check(jax.random.uniform(k2, (1, 2, 320, 256), dtype=jnp.float32),
           tv_weight=0.5, rtol=2e-4, atol=1e-4)

    # 3) Ragged plane count (n=10, tb=8): exercises the masked tail block.
    _check(jax.random.uniform(k3, (2, 5, 16, 16), dtype=jnp.float32),
           tv_weight=1.0, rtol=1e-4, atol=1e-5)

    # 4) bf16 input (upcast to f32 inside the kernel).
    _check(jax.random.uniform(k1, (2, 4, 16, 16),
                              dtype=jnp.float32).astype(jnp.bfloat16),
           tv_weight=1.0, rtol=1e-4, atol=1e-5)

    # 5) Big plane: exercises the roll+mask plane path.
    _check(jax.random.uniform(k4, (1, 1, 512, 512), dtype=jnp.float32),
           tv_weight=1.0, rtol=2e-4, atol=1e-4)

    print("KERNEL_OK")
</pallas_src>

<mosaic_0001>
module attributes {stable_mosaic.version = 11 : i64} {
  func.func @_tv_flat_kernel(%arg0: i32, %arg1: memref<1x256xf32, #tpu.memory_space<vmem>>, %arg2: memref<1x256xf32, #tpu.memory_space<vmem>>, %arg3: memref<8x256xf32, #tpu.memory_space<vmem>>, %arg4: memref<1x1x2xf32, #tpu.memory_space<vmem>>) attributes {dimension_semantics = [#tpu.dimension_semantics<parallel>], iteration_bounds = array<i64: 1>, scalar_prefetch = 0 : i64, scratch_operands = 0 : i64, tpu.core_type = #tpu.core_type<tc>, window_params = [{pipeline_mode = #tpu.pipeline_mode<synchronous>, transform_indices = @transform_0, window_bounds = array<i64: 1, 256>}, {pipeline_mode = #tpu.pipeline_mode<synchronous>, transform_indices = @transform_1, window_bounds = array<i64: 1, 256>}, {transform_indices = @transform_2, window_bounds = array<i64: 8, 256>}, {transform_indices = @transform_3, window_bounds = array<i64: 1, 1, 2>}]} {
    %c0 = arith.constant 0 : index
    %c0_0 = arith.constant 0 : index
    %0 = vector.load %arg3[%c0, %c0_0] : memref<8x256xf32, #tpu.memory_space<vmem>>, vector<8x256xf32>
    %c255_i32 = arith.constant 255 : i32
    %1 = tpu.dynamic_rotate %0 by %c255_i32 dim 1 : vector<8x256xf32>, i32 -> vector<8x256xf32>
    %c240_i32 = arith.constant 240 : i32
    %2 = tpu.dynamic_rotate %0 by %c240_i32 dim 1 : vector<8x256xf32>, i32 -> vector<8x256xf32>
    %3 = arith.subf %2, %0 : vector<8x256xf32>
    %c0_1 = arith.constant 0 : index
    %c0_2 = arith.constant 0 : index
    %4 = vector.load %arg1[%c0_1, %c0_2] : memref<1x256xf32, #tpu.memory_space<vmem>>, vector<1x256xf32>
    %5 = vector.broadcast %4 : vector<1x256xf32> to vector<8x256xf32>
    %6 = arith.mulf %3, %5 : vector<8x256xf32>
    %7 = arith.subf %1, %0 : vector<8x256xf32>
    %c0_3 = arith.constant 0 : index
    %c0_4 = arith.constant 0 : index
    %8 = vector.load %arg2[%c0_3, %c0_4] : memref<1x256xf32, #tpu.memory_space<vmem>>, vector<1x256xf32>
    %9 = vector.broadcast %8 : vector<1x256xf32> to vector<8x256xf32>
    %10 = arith.mulf %7, %9 : vector<8x256xf32>
    %11 = arith.mulf %6, %6 : vector<8x256xf32>
    %12 = vector.shape_cast %11 : vector<8x256xf32> to vector<1x8x256xf32>
    %cst = arith.constant dense<0.000000e+00> : vector<1xf32>
    %13 = vector.multi_reduction <add>, %12, %cst [1, 2] : vector<1x8x256xf32> to vector<1xf32>
    %14 = vector.shape_cast %13 : vector<1xf32> to vector<1x1x1xf32>
    %15 = vector.extract %14[0, 0, 0] : f32 from vector<1x1x1xf32>
    %16 = arith.mulf %10, %10 : vector<8x256xf32>
    %17 = vector.shape_cast %16 : vector<8x256xf32> to vector<1x8x256xf32>
    %cst_5 = arith.constant dense<0.000000e+00> : vector<1xf32>
    %18 = vector.multi_reduction <add>, %17, %cst_5 [1, 2] : vector<1x8x256xf32> to vector<1xf32>
    %19 = vector.shape_cast %18 : vector<1xf32> to vector<1x1x1xf32>
    %20 = vector.extract %19[0, 0, 0] : f32 from vector<1x1x1xf32>
    %21 = tpu.iota {dimensions = array<i32: 2>} : vector<1x1x2xi32>
    %c0_i32 = arith.constant 0 : i32
    %22 = vector.broadcast %c0_i32 : i32 to vector<1x1x2xi32>
    %23 = arith.cmpi eq, %21, %22 : vector<1x1x2xi32>
    %24 = vector.broadcast %15 : f32 to vector<1x1x2xf32>
    %25 = vector.broadcast %20 : f32 to vector<1x1x2xf32>
    %26 = arith.select %23, %24, %25 : vector<1x1x2xi1>, vector<1x1x2xf32>
    %c0_6 = arith.constant 0 : index
    %c0_7 = arith.constant 0 : index
    %c0_8 = arith.constant 0 : index
    %27 = vector.load %arg4[%c0_6, %c0_7, %c0_8] : memref<1x1x2xf32, #tpu.memory_space<vmem>>, vector<1x1x2xf32>
    tpu.vector_store %arg4[%c0_6, %c0_7, %c0_8], %26 {strides = array<i32>} : memref<1x1x2xf32, #tpu.memory_space<vmem>>, vector<1x1x2xf32>,
    return
  }
  func.func @transform_0(%arg0: i32) -> (i32, i32) {
    %c0_i32 = arith.constant 0 : i32
    %c0_i32_0 = arith.constant 0 : i32
    %c0_i32_1 = arith.constant 0 : i32
    return %c0_i32, %c0_i32_0 : i32, i32
  }
  func.func @transform_1(%arg0: i32) -> (i32, i32) {
    %c0_i32 = arith.constant 0 : i32
    %c0_i32_0 = arith.constant 0 : i32
    %c0_i32_1 = arith.constant 0 : i32
    return %c0_i32, %c0_i32_0 : i32, i32
  }
  func.func @transform_2(%arg0: i32) -> (i32, i32) {
    %c0_i32 = arith.constant 0 : i32
    %c0_i32_0 = arith.constant 0 : i32
    return %arg0, %c0_i32 : i32, i32
  }
  func.func @transform_3(%arg0: i32) -> (i32, i32, i32) {
    %c0_i32 = arith.constant 0 : i32
    %c0_i32_0 = arith.constant 0 : i32
    %c0_i32_1 = arith.constant 0 : i32
    return %arg0, %c0_i32, %c0_i32_0 : i32, i32, i32
  }
}

</mosaic_0001>

<bundles_post_ra>
// kernel: tpu_custom_call.1
= control target key start
LH: loop header
LB: loop body
LE: loop exit
PB: predicated region body
PF: predicated region fallthrough
CT: control target
= control target key end

     0   :  { %8 = vsyncpa [#allocation3], 0  ;;  %s280_s0 = inlined_call_operand.hbm [shape: f32[1,256], index: 0, kind: input, shape index: {}]   ;;  %s281_s1 = inlined_call_operand.vmem [shape: f32[1,256], index: 1, kind: input, shape index: {}]   ;;  %s282_s2 = inlined_call_operand.hbm [shape: f32[8,256], index: 2, kind: input, shape index: {}]   ;;  %s283_s3 = inlined_call_operand.hbm [shape: f32[1,1,2], index: 3, kind: output, shape index: {}]  }
   0x1   :  { %9 = vsyncpa [#allocation6], 0 }
   0x2   :  { %10 = vsyncpa [#allocation4], 0  ;;  %s216_s12 = smov [#allocation2]   ;;  %s217_s14 = smov [#allocation5]  }
   0x3   :  { %s17_s13 = sshll.u32 %s216_s12, 4  ;;  %s29_s15 = sshll.u32 %s217_s14, 4  ;;  %s18_s13 = int_to_ptr.vmem [resolvable:$true] %s17_s13  ;;  %s30_s15 = int_to_ptr.vmem [resolvable:$true] %s29_s15 }
   0x4   :  { %s144_s18 = scalar_lea.hbm %s280_s0, 32 }
   0x5   :  { %p145_p0 = scmp.ne.s32.totalorder %s280_s0, %s144_s18  ;;  %p148_p1 = scmp.lt.u32.totalorder %s144_s18, %s280_s0 }
   0x7   :  { %p150_p2 = pnand %p148_p1, %p145_p0 }
   0x9   :  { %153 = shalt.err (!%p150_p2)
}
   0xa   :  { %s154_s23 = scalar_lea.vmem %s18_s13, 32  ;;  %p159_p4 = scmp.lt.s32.totalorder %s18_s13, %s18_s13 }
   0xb   :  { %p155_p3 = scmp.ne.s32.totalorder %s18_s13, %s154_s23  ;;  %p160_p5 = scmp.lt.s32.totalorder %s154_s23, %s154_s23 }
   0xd   :  { %p161_p6 = por %p160_p5, %p159_p4 }
   0xf   :  { %p162_p7 = pnand %p161_p6, %p155_p3 }
  0x11   :  { %165 = shalt.err (!%p162_p7)
}
  0x12   :  { %20 = dma.hbm_to_vmem [thread:$0]  %s280_s0, 32, %s18_s13, [#allocation3]  }
  0x13   :  { %s166_s28 = scalar_lea.hbm %s282_s2, 256 }
  0x14   :  { %p167_p8 = scmp.ne.s32.totalorder %s282_s2, %s166_s28  ;;  %p170_p9 = scmp.lt.u32.totalorder %s166_s28, %s282_s2 }
  0x16   :  { %p172_p10 = pnand %p170_p9, %p167_p8 }
  0x18   :  { %175 = shalt.err (!%p172_p10)
}
  0x19   :  { %s176_s6 = scalar_lea.vmem %s30_s15, 256  ;;  %p181_p12 = scmp.lt.s32.totalorder %s30_s15, %s30_s15 }
  0x1a   :  { %p177_p11 = scmp.ne.s32.totalorder %s30_s15, %s176_s6  ;;  %p182_p13 = scmp.lt.s32.totalorder %s176_s6, %s176_s6 }
  0x1c   :  { %p183_p0 = por %p182_p13, %p181_p12 }
  0x1e   :  { %p184_p1 = pnand %p183_p0, %p177_p11 }
  0x20   :  { %187 = shalt.err (!%p184_p1)
}
  0x21   :  { %32 = dma.hbm_to_vmem [thread:$0]  %s282_s2, 256, %s30_s15, [#allocation6]  }
  0x22   :  { %210 = dma.done.wait [#allocation3], 32  }
  0x23   :  { %211 = vsyncadd [#allocation3], 4294967264 }
  0x24   :  { %212 = dma.done.wait [#allocation6], 256  }
  0x25   :  { %213 = vsyncadd [#allocation6], 4294967040  ;;  %v39_v0 = vld [vmem:[#allocation5] sm:$0xff]  ;;  %s218_s8 = smov 112   ;;  %s219_s9 = smov 127   ;;  %v40_v1 = vld [vmem:[#allocation5 + $0x8] sm:$0xff]  ;;  %v45_v2 = vlaneseq }
  0x26   :  { %50 = vrot.lane.b32.xlu1 %v39_v0, %s218_s8  ;;  %41 = vrot.lane.b32.xlu0 %v39_v0, %s219_s9  ;;  %v59_v9 = vld [vmem:[#allocation2] sm:$0x3]  ;;  %vm117_vm3 = vcmask 8192  }
  0x27   :  { %v62_v3 = vshrl.u32 %v45_v2, 7  ;;  %v46_v4 = vand.u32 127, %v45_v2  ;;  %v75_v10 = vld [vmem:[%s281_s1] sm:$0x3]  ;;  %s220_s1 = smov [#allocation7]  }
  0x28   :  { %s125_s11 = sshll.u32 %s220_s1, 4  ;;  %s126_s11 = int_to_ptr.vmem [resolvable:$true] %s125_s11 }
  0x29   :  { %v63_v7 = vsub.s32 0, %v62_v3  ;;  %v67_v8 = vsub.s32 1, %v62_v3  ;;  %vm54_vm0 = vcmp.lt.s32.totalorder %v46_v4, 112  ;;  %vm47_vm1 = vcmp.lt.s32.totalorder %v46_v4, 127  ;;  %s188_s14 = scalar_lea.vmem %s126_s11, 16  ;;  %s192_s15 = scalar_lea.vmem %s126_s11, 32 }
  0x2a   :  { %52 = vrot.lane.b32.xlu1 %v40_v1, %s218_s8  ;;  %43 = vrot.lane.b32.xlu0 %v40_v1, %s219_s9  ;;  %vm113_vm2 = vcmp.eq.s32.totalorder %v46_v4, 0  ;;  %p189_p2 = scmp.ne.s32.totalorder %s126_s11, %s188_s14  ;;  %p193_p3 = scmp.lt.s32.totalorder %s126_s11, %s126_s11 }
  0x2b   :  { %v64_v13 = vrot.slane %v59_v9, %v63_v7  ;;  %v68_v14 = vrot.slane %v59_v9, %v67_v8  ;;  %v80_v15 = vrot.slane %v75_v10, %v63_v7  ;;  %v84_v16 = vrot.slane %v75_v10, %v67_v8  ;;  %p194_p4 = scmp.lt.s32.totalorder %s192_s15, %s188_s14 }
  0x2d   :  { %p195_p5 = por %p194_p4, %p193_p3 }
  0x2f   :  { %p196_p6 = pnand %p195_p5, %p189_p2 }
  0x98   :  { %v51_v5 = vpop.permute.xlu1 %50  ;;  %v42_v6 = vpop.permute.xlu0 %41 }
  0x9c   :  { %v53_v11 = vpop.permute.xlu1 %52  ;;  %v44_v12 = vpop.permute.xlu0 %43 }
  0x9d   :  { %v55_v17 = vsel %vm54_vm0, %v51_v5, %v53_v11  ;;  %v56_v18 = vsel %vm54_vm0, %v53_v11, %v51_v5  ;;  %v48_v19 = vsel %vm47_vm1, %v42_v6, %v44_v12  ;;  %v49_v20 = vsel %vm47_vm1, %v44_v12, %v42_v6 }
  0x9e   :  { %v57_v21 = vsub.f32 %v55_v17, %v39_v0  ;;  %v58_v22 = vsub.f32 %v56_v18, %v40_v1  ;;  %v73_v23 = vsub.f32 %v48_v19, %v39_v0  ;;  %v74_v24 = vsub.f32 %v49_v20, %v40_v1 }
  0xa0   :  { %v71_v25 = vmul.f32 %v64_v13, %v57_v21  ;;  %v72_v26 = vmul.f32 %v68_v14, %v58_v22  ;;  %v87_v27 = vmul.f32 %v80_v15, %v73_v23  ;;  %v88_v28 = vmul.f32 %v84_v16, %v74_v24 }
  0xa2   :  { %v89_v29 = vmul.f32 %v71_v25, %v71_v25  ;;  %v90_v30 = vmul.f32 %v72_v26, %v72_v26  ;;  %v101_v31 = vmul.f32 %v87_v27, %v87_v27  ;;  %v102_v32 = vmul.f32 %v88_v28, %v88_v28 }
  0xa4   :  { %v91_v33 = vadd.f32 %v90_v30, %v89_v29  ;;  %v103_v34 = vadd.f32 %v102_v32, %v101_v31 }
  0xa6   :  { %92 = vadd.xlane.f32.xlu0 %v91_v33  ;;  %104 = vadd.xlane.f32.xlu1 %v103_v34 }
 0x133   :  { %v105_v35 = vpop.xlane.xlu1 %104  ;;  %v93_v36 = vpop.xlane.xlu0 %92 }
 0x134   :  { %v106_v37 = vrot.slane %v105_v35, 4  ;;  %v94_v38 = vrot.slane %v93_v36, 4 }
 0x136   :  { %v107_v39 = vadd.f32 %v106_v37, %v105_v35  ;;  %v95_v40 = vadd.f32 %v94_v38, %v93_v36 }
 0x138   :  { %v108_v41 = vrot.slane %v107_v39, 2  ;;  %v96_v42 = vrot.slane %v95_v40, 2 }
 0x13a   :  { %v109_v43 = vadd.f32 %v108_v41, %v107_v39  ;;  %v97_v44 = vadd.f32 %v96_v42, %v95_v40 }
 0x13c   :  { %v98_v45 = vrot.slane %v97_v44, 1  ;;  %v110_v46 = vrot.slane %v109_v43, 1 }
 0x13e   :  { %v99_v47 = vadd.f32 %v98_v45, %v97_v44  ;;  %v111_v48 = vadd.f32 %v110_v46, %v109_v43 }
 0x140   :  { %135 = vpush %v99_v47 }
 0x141   :  { %137 = vpush %v111_v48 }
 0x171   :  { %s136_s12 = spop %135 }
 0x172   :  { %v114_v49 = vstv %s136_s12  ;;  %s138_s13 = spop %137 }
 0x173   :  { %v115_v50 = vstv %s138_s13 }
 0x174   :  { %v116_v51 = vsel %vm113_vm2, %v114_v49, %v115_v50 }
 0x175   :  { %118 = vst.msk [vmem:[#allocation7] sm:$0x1] %vm117_vm3, %v116_v51 }
 0x176   :  { %199 = shalt.err (!%p196_p6)
}
 0x177   :  { %s200_s18 = scalar_lea.hbm %s283_s3, 16 }
 0x178   :  { %p201_p7 = scmp.ne.s32.totalorder %s283_s3, %s200_s18  ;;  %p204_p8 = scmp.lt.u32.totalorder %s200_s18, %s283_s3 }
 0x17a   :  { %p206_p9 = pnand %p204_p8, %p201_p7 }
 0x17c   :  { %209 = shalt.err (!%p206_p9)
}
 0x17d   :  { %128 = dma.vmem_to_hbm [thread:$0]  %s126_s11, 16, %s283_s3, [#allocation4]  }
 0x17e   :  { %214 = dma.done.wait [#allocation4], 16  }
 0x17f   :  { %215 = vsyncadd [#allocation4], 4294967280 }
 0x180   :  { %132 = vsyncpa [#allocation3], 1 }
 0x181   :  { %133 = vsyncpa [#allocation6], 1 }
 0x182   :  { %134 = vsyncpa [#allocation4], 1 }

</bundles_post_ra>
